<compile_context>
chip_gen: v6e
topology: v6e:2x2x1
jax: 0.10.0
libtpu: 0.0.40
codegen_flags: <defaults>
</compile_context>

<pallas_src>
import math

import jax
import jax.numpy as jnp
import numpy as np
from jax.experimental import pallas as pl
from jax.experimental.pallas import tpu as pltpu


def _round_up(x, mult):
    return ((x + mult - 1) // mult) * mult


def _device_info():
    """Returns (usable VMEM bytes per TensorCore, #TCs for 'parallel' axes, is_v7x)."""
    vmem_bytes = 64 << 20          # conservative default (v7x per-TC VMEM)
    num_tc = 1
    is_v7x = False
    try:
        vmem_bytes = int(pltpu.get_tpu_info().vmem_capacity_bytes)
    except Exception:
        pass
    try:
        kind = jax.devices()[0].device_kind.lower()
        if ("v7" in kind) or ("tpu7" in kind) or kind.endswith("7x"):
            is_v7x = True
            num_tc = 2
    except Exception:
        pass
    if is_v7x:
        vmem_bytes = min(vmem_bytes, 64 << 20)
    return vmem_bytes, num_tc, is_v7x


def _linear_kernel(x_ref, w_ref, b_ref, o_ref):
    """Full-K contraction for one (tm, tn) output tile (no K grid axis).

    x_ref: (tm, K)   w_ref: (K, tn)   b_ref: (1, tn) f32   o_ref: (tm, tn)
    """
    o_ref[...] = (
        jnp.dot(x_ref[...], w_ref[...], preferred_element_type=jnp.float32)
        + b_ref[...]
    ).astype(o_ref.dtype)


def _linear_acc_kernel(x_ref, w_ref, b_ref, o_ref, acc_ref):
    """K-split variant: f32 VMEM accumulator across the innermost grid axis."""
    @pl.when(pl.program_id(2) == 0)
    def _():
        acc_ref[...] = jnp.zeros_like(acc_ref)

    acc_ref[...] += jnp.dot(
        x_ref[...], w_ref[...], preferred_element_type=jnp.float32)

    @pl.when(pl.program_id(2) == pl.num_programs(2) - 1)
    def _():
        o_ref[...] = (acc_ref[...] + b_ref[...]).astype(o_ref.dtype)


def adaptive_input_forward(x, weight, bias, *, compute_dtype=None):
    """y = x @ weight.T + bias over the last axis of x.

    Args:
      x:      (..., source_dim)
      weight: (target_dim, source_dim)  -- PyTorch nn.Linear convention
      bias:   (target_dim,)
      compute_dtype: optional reduced-precision matmul operand dtype
                     (e.g. jnp.bfloat16); accumulation stays float32.
    Returns:
      (..., target_dim) in x.dtype
    """
    source_dim = x.shape[-1]
    target_dim, w_src = weight.shape
    assert w_src == source_dim
    assert bias.shape == (target_dim,)

    lead_shape = x.shape[:-1]
    m = math.prod(lead_shape) if lead_shape else 1
    out_dtype = x.dtype
    out_itemsize = jnp.dtype(out_dtype).itemsize

    x2d = x.reshape(m, source_dim)
    b2d = bias.astype(jnp.float32).reshape(1, target_dim)

    # ---- tiny-problem fallback: launch/step overhead and masked stores
    # dominate below vreg/tile scale; a fused XLA dot is strictly better. ----
    if m < 8 or m * source_dim * target_dim < 128 * 128 * 128:
        out2d = (jax.lax.dot_general(
            x2d, weight,
            dimension_numbers=(((1,), (1,)), ((), ())),
            preferred_element_type=jnp.float32) + b2d).astype(out_dtype)
        return out2d.reshape(*lead_shape, target_dim)

    # ---- canonicalize the weight for the MXU: one transpose (fused with the
    # optional cast) in the wrapper instead of nm per-tile transposes that
    # would share the vector-extended issue slot with vmatmul. ---------------
    # TODO(synk): in a stateful module, cache the pre-transposed / pre-cast
    # weight across calls so this one-time pass amortizes to zero.
    if compute_dtype is not None and compute_dtype != x2d.dtype:
        x2d = x2d.astype(compute_dtype)
        wt = weight.T.astype(compute_dtype)
    else:
        wt = weight.T
    itemsize = jnp.dtype(x2d.dtype).itemsize
    sub = 16 if itemsize == 2 else 8        # sublane multiple for the M dim

    vmem_bytes, num_tc, is_v7x = _device_info()
    budget = int(vmem_bytes * 0.55)

    # ---- generation-aware tile caps ----------------------------------------
    tm_cap = 512 if is_v7x else (2048 if itemsize == 2 else 1024)
    tn_cap = 512 if is_v7x else 1024
    tm = min(tm_cap, _round_up(m, sub))
    tn = target_dim if target_dim <= tn_cap else tn_cap   # lane-dense (mult of 128)

    def _ws(tk_, acc):
        return (2 * (tm * tk_ + tk_ * tn) * itemsize     # double-buffered x, w
                + 2 * tn * 4                             # bias
                + 2 * tm * tn * out_itemsize             # double-buffered out
                + (tm * tn * 4 if acc else 0))           # f32 accumulator

    # ---- K tile: full K when it fits the VMEM budget; otherwise split with
    # an exact divisor, or zero-pad K (numerically exact) so the accumulator
    # never sees garbage and tiles stay within v7x's 64 MiB. -----------------
    K = source_dim
    K_pad = K
    if _ws(K, acc=False) <= budget:
        tk = K
    else:
        tk = 0
        for cand in (2048, 1024, 512, 256):
            if K % cand == 0 and _ws(cand, acc=True) <= budget:
                tk = cand
                break
        if tk == 0:
            for cand in (2048, 1024, 512, 256):
                if _ws(cand, acc=True) <= budget:
                    nk_ = pl.cdiv(K, cand)
                    tk = _round_up(pl.cdiv(K, nk_), 256)
                    K_pad = nk_ * tk
                    break
        if tk == 0:                                       # should not happen
            tk = 256
            K_pad = _round_up(K, tk)
    nk = K_pad // tk

    if K_pad != K:
        x2d = jnp.pad(x2d, ((0, 0), (0, K_pad - K)))
        wt = jnp.pad(wt, ((0, K_pad - K), (0, 0)))

    nm = pl.cdiv(m, tm)
    nn_ = pl.cdiv(target_dim, tn)

    x_bytes = m * K_pad * itemsize
    w_bytes = K_pad * target_dim * itemsize

    # ---- megacore: only force a split when the parallel product is 1 and we
    # actually have 2 TensorCores; split the axis whose redundant re-read is
    # the cheaper operand. Single-TC chips (v5e/v6e) never force a split. ----
    if num_tc >= 2 and nm * nn_ == 1:
        can_split_m = m >= 2 * sub
        can_split_n = target_dim >= 256
        if can_split_n and (x_bytes <= w_bytes or not can_split_m):
            tn = _round_up(pl.cdiv(target_dim, 2), 128)
            nn_ = pl.cdiv(target_dim, tn)
        elif can_split_m:
            tm = _round_up(pl.cdiv(m, 2), sub)
            nm = pl.cdiv(m, tm)

    # ---- grid order: with no K split, put the dominant operand's block index
    # on the OUTER axis so it streams from HBM exactly once. -----------------
    if nk == 1:
        w_outer = (w_bytes + nn_ * x_bytes) < (x_bytes + nm * w_bytes)
        if w_outer:
            grid = (nn_, nm)
            x_map = lambda j, i: (i, 0)
            w_map = lambda j, i: (0, j)
            b_map = lambda j, i: (0, j)
            o_map = lambda j, i: (i, j)
        else:
            grid = (nm, nn_)
            x_map = lambda i, j: (i, 0)
            w_map = lambda i, j: (0, j)
            b_map = lambda i, j: (0, j)
            o_map = lambda i, j: (i, j)
        kernel = _linear_kernel
        scratch = []
        dims = ("parallel", "parallel")
        hbm_reads = (w_bytes + nn_ * x_bytes) if w_outer else (x_bytes + nm * w_bytes)
    else:
        grid = (nm, nn_, nk)
        x_map = lambda i, j, k: (i, k)
        w_map = lambda i, j, k: (k, j)
        b_map = lambda i, j, k: (0, j)
        o_map = lambda i, j, k: (i, j)
        kernel = _linear_acc_kernel
        scratch = [pltpu.VMEM((tm, tn), jnp.float32)]
        dims = ("parallel", "parallel", "arbitrary")
        hbm_reads = nn_ * x_bytes + nm * w_bytes

    ws_bytes = _ws(tk, acc=(nk > 1))
    vmem_limit = int(min(max(ws_bytes * 2, 16 << 20), int(vmem_bytes * 0.9)))

    cost = pl.CostEstimate(
        flops=2 * m * K_pad * target_dim,
        transcendentals=0,
        bytes_accessed=hbm_reads + target_dim * 4 + m * target_dim * out_itemsize)

    out2d = pl.pallas_call(
        kernel,
        out_shape=jax.ShapeDtypeStruct((m, target_dim), out_dtype),
        grid_spec=pltpu.PrefetchScalarGridSpec(
            num_scalar_prefetch=0,
            grid=grid,
            in_specs=[
                pl.BlockSpec((tm, tk), x_map),
                pl.BlockSpec((tk, tn), w_map),
                pl.BlockSpec((1, tn), b_map),
            ],
            out_specs=pl.BlockSpec((tm, tn), o_map),
            scratch_shapes=scratch,
        ),
        compiler_params=pltpu.CompilerParams(
            dimension_semantics=dims,
            vmem_limit_bytes=vmem_limit),
        cost_estimate=cost,
    )(x2d, wt, b2d)

    return out2d.reshape(*lead_shape, target_dim)


def init_linear_params(key, source_dim, target_dim, dtype=jnp.float32):
    """Deterministic init mimicking PyTorch nn.Linear defaults."""
    kw, kb = jax.random.split(key)
    bound = 1.0 / (source_dim ** 0.5)
    weight = jax.random.uniform(
        kw, (target_dim, source_dim), dtype=dtype, minval=-bound, maxval=bound)
    bias = jax.random.uniform(
        kb, (target_dim,), dtype=dtype, minval=-bound, maxval=bound)
    return weight, bias


if __name__ == "__main__":
    key = jax.random.PRNGKey(0)
    kx, kp, ks, kq, kr, kt = jax.random.split(key, 6)

    # ---- Pallas path: x [batch=2, seq=64, source_dim=128] -> target_dim=256
    batch, seq, source_dim, target_dim = 2, 64, 128, 256
    x = jax.random.normal(kx, (batch, seq, source_dim), dtype=jnp.float32)
    weight, bias = init_linear_params(kp, source_dim, target_dim)

    y = jax.block_until_ready(adaptive_input_forward(x, weight, bias))
    assert y.shape == (batch, seq, target_dim)
    y_ref = (np.asarray(x, np.float64) @ np.asarray(weight, np.float64).T
             + np.asarray(bias, np.float64))
    np.testing.assert_allclose(np.asarray(y), y_ref, atol=2e-3, rtol=2e-3)

    # ---- bf16-operand variant (f32 accumulation), the reduced-precision MXU path.
    y_bf16 = jax.block_until_ready(
        adaptive_input_forward(x, weight, bias, compute_dtype=jnp.bfloat16))
    np.testing.assert_allclose(np.asarray(y_bf16), y_ref, atol=5e-2, rtol=5e-2)

    # ---- weight-dominant shape (exercises the W-outer grid ordering path).
    x_w = jax.random.normal(kr, (2, 32, 128), dtype=jnp.float32)
    w_w, b_w = init_linear_params(kt, 128, 512)
    y_w = jax.block_until_ready(adaptive_input_forward(x_w, w_w, b_w))
    y_w_ref = (np.asarray(x_w, np.float64) @ np.asarray(w_w, np.float64).T
               + np.asarray(b_w, np.float64))
    np.testing.assert_allclose(np.asarray(y_w), y_w_ref, atol=2e-3, rtol=2e-3)

    # ---- Tiny-problem fallback path (original demo shape: 2x8x32 -> 64).
    x_small = jax.random.normal(ks, (2, 8, 32), dtype=jnp.float32)
    w_s, b_s = init_linear_params(kq, 32, 64)
    y_small = jax.block_until_ready(adaptive_input_forward(x_small, w_s, b_s))
    y_small_ref = (np.asarray(x_small, np.float64) @ np.asarray(w_s, np.float64).T
                   + np.asarray(b_s, np.float64))
    np.testing.assert_allclose(np.asarray(y_small), y_small_ref,
                               atol=1e-4, rtol=1e-4)

    print("KERNEL_OK")
</pallas_src>

<mosaic_0001>
module attributes {stable_mosaic.version = 11 : i64} {
  func.func @_linear_kernel(%arg0: i32, %arg1: i32, %arg2: memref<128x128xf32, #tpu.memory_space<vmem>>, %arg3: memref<128x256xf32, #tpu.memory_space<vmem>>, %arg4: memref<1x256xf32, #tpu.memory_space<vmem>>, %arg5: memref<128x256xf32, #tpu.memory_space<vmem>>) attributes {dimension_semantics = [#tpu.dimension_semantics<parallel>, #tpu.dimension_semantics<parallel>], iteration_bounds = array<i64: 1, 1>, scalar_prefetch = 0 : i64, scratch_operands = 0 : i64, tpu.core_type = #tpu.core_type<tc>, window_params = [{transform_indices = @transform_0, window_bounds = array<i64: 128, 128>}, {transform_indices = @transform_1, window_bounds = array<i64: 128, 256>}, {transform_indices = @transform_2, window_bounds = array<i64: 1, 256>}, {transform_indices = @transform_3, window_bounds = array<i64: 128, 256>}]} {
    %c0 = arith.constant 0 : index
    %c0_0 = arith.constant 0 : index
    %0 = vector.load %arg2[%c0, %c0_0] : memref<128x128xf32, #tpu.memory_space<vmem>>, vector<128x128xf32>
    %c0_1 = arith.constant 0 : index
    %c0_2 = arith.constant 0 : index
    %1 = vector.load %arg3[%c0_1, %c0_2] : memref<128x256xf32, #tpu.memory_space<vmem>>, vector<128x256xf32>
    %cst = arith.constant dense<0.000000e+00> : vector<128x256xf32>
    %2 = tpu.matmul %0, %1, %cst {dimension_numbers = #tpu.dot_dimension_numbers<[1], [0], [0], [1], [0, 0, 1, 1], [], []>} : vector<128x128xf32>, vector<128x256xf32>, vector<128x256xf32> -> vector<128x256xf32>
    %c0_3 = arith.constant 0 : index
    %c0_4 = arith.constant 0 : index
    %3 = vector.load %arg4[%c0_3, %c0_4] : memref<1x256xf32, #tpu.memory_space<vmem>>, vector<1x256xf32>
    %4 = vector.broadcast %3 : vector<1x256xf32> to vector<128x256xf32>
    %5 = arith.addf %2, %4 : vector<128x256xf32>
    %c0_5 = arith.constant 0 : index
    %c0_6 = arith.constant 0 : index
    %6 = vector.load %arg5[%c0_5, %c0_6] : memref<128x256xf32, #tpu.memory_space<vmem>>, vector<128x256xf32>
    tpu.vector_store %arg5[%c0_5, %c0_6], %5 {strides = array<i32>} : memref<128x256xf32, #tpu.memory_space<vmem>>, vector<128x256xf32>,
    return
  }
  func.func @transform_0(%arg0: i32, %arg1: i32) -> (i32, i32) {
    %c0_i32 = arith.constant 0 : i32
    %c0_i32_0 = arith.constant 0 : i32
    return %arg0, %c0_i32 : i32, i32
  }
  func.func @transform_1(%arg0: i32, %arg1: i32) -> (i32, i32) {
    %c0_i32 = arith.constant 0 : i32
    %c0_i32_0 = arith.constant 0 : i32
    return %c0_i32, %arg1 : i32, i32
  }
  func.func @transform_2(%arg0: i32, %arg1: i32) -> (i32, i32) {
    %c0_i32 = arith.constant 0 : i32
    %c0_i32_0 = arith.constant 0 : i32
    return %c0_i32, %arg1 : i32, i32
  }
  func.func @transform_3(%arg0: i32, %arg1: i32) -> (i32, i32) {
    %c0_i32 = arith.constant 0 : i32
    return %arg0, %arg1 : i32, i32
  }
}

</mosaic_0001>

<bundles_post_ra>
// kernel: tpu_custom_call.1
= control target key start
LH: loop header
LB: loop body
LE: loop exit
PB: predicated region body
PF: predicated region fallthrough
CT: control target
= control target key end

     0   :  { %8 = vsyncpa [#allocation3], 0  ;;  %s518_s0 = inlined_call_operand.hbm [shape: f32[128,128], index: 0, kind: input, shape index: {}]   ;;  %s519_s1 = inlined_call_operand.hbm [shape: f32[128,256], index: 1, kind: input, shape index: {}]   ;;  %s520_s2 = inlined_call_operand.vmem [shape: f32[1,256], index: 2, kind: input, shape index: {}]   ;;  %s521_s3 = inlined_call_operand.hbm [shape: f32[128,256], index: 3, kind: output, shape index: {}]  }
   0x1   :  { %9 = vsyncpa [#allocation6], 0 }
   0x2   :  { %10 = vsyncpa [#allocation4], 0  ;;  %s420_s12 = smov [#allocation2]  }
   0x3   :  { %s16_s13 = sshll.u32 %s420_s12, 4  ;;  %s17_s13 = int_to_ptr.vmem [resolvable:$true] %s16_s13 }
   0x4   :  { %s362_s14 = scalar_lea.vmem %s17_s13, 2048  ;;  %p367_p1 = scmp.lt.s32.totalorder %s17_s13, %s17_s13 }
   0x5   :  { %p363_p0 = scmp.ne.s32.totalorder %s17_s13, %s362_s14  ;;  %p368_p2 = scmp.lt.s32.totalorder %s362_s14, %s362_s14 }
   0x7   :  { %p369_p3 = por %p368_p2, %p367_p1 }
   0x9   :  { %p370_p4 = pnand %p369_p3, %p363_p0 }
   0xb   :  { %373 = shalt.err (!%p370_p4)
}
   0xc   :  { %s421_s15 = smov 128   ;;  %s422_s16 = smov 8  }
   0xd   :  { %22 = dma.hbm_to_vmem [thread:$0]  %s518_s0, 2048, %s17_s13, [#allocation3], %s421_s15, %s421_s15, %s422_s16  }
   0xe   :  { %s423_s19 = smov [#allocation5]  }
   0xf   :  { %s28_s20 = sshll.u32 %s423_s19, 4  ;;  %s29_s20 = int_to_ptr.vmem [resolvable:$true] %s28_s20 }
  0x10   :  { %s382_s21 = scalar_lea.vmem %s29_s20, 4096  ;;  %p387_p6 = scmp.lt.s32.totalorder %s29_s20, %s29_s20 }
  0x11   :  { %p383_p5 = scmp.ne.s32.totalorder %s29_s20, %s382_s21  ;;  %p388_p7 = scmp.lt.s32.totalorder %s382_s21, %s382_s21 }
  0x13   :  { %p389_p8 = por %p388_p7, %p387_p6 }
  0x15   :  { %p390_p9 = pnand %p389_p8, %p383_p5 }
  0x17   :  { %393 = shalt.err (!%p390_p9)
}
  0x18   :  { %s424_s22 = smov 256   ;;  %s425_s23 = smov 16  }
  0x19   :  { %34 = dma.hbm_to_vmem [thread:$0]  %s519_s1, 4096, %s29_s20, [#allocation6], %s424_s22, %s424_s22, %s425_s23  }
  0x1a   :  { %414 = dma.done.wait [#allocation3], 2048  }
  0x1b   :  { %415 = vsyncadd [#allocation3], 4294965248 }
  0x1c   :  { %416 = dma.done.wait [#allocation6], 4096  }
  0x1d   :  { %417 = vsyncadd [#allocation6], 4294963200  ;;  %v426_v0 = vmov 0.0   ;;  %v90_v1 = vld [vmem:[#allocation5 + $0xf8] sm:$0xff]  ;;  %v89_v2 = vld [vmem:[#allocation5 + $0xf0] sm:$0xff]  ;;  %v93_v49 = vlaneseq }
  0x1e   :  { %167 = vmatprep.mubr.f32.mxu0 %v426_v0  ;;  %215 = vmatprep.mubr.f32.mxu1 %v426_v0  ;;  %v88_v3 = vld [vmem:[#allocation5 + $0xe8] sm:$0xff]  ;;  %v87_v4 = vld [vmem:[#allocation5 + $0xe0] sm:$0xff]  ;;  %v86_v5 = vld [vmem:[#allocation5 + $0xd8] sm:$0xff] }
  0x1f   :  { %103 = vmatprep.subr.mxu0 %v90_v1  ;;  %314 = vmatprep.subr.mxu1 %v90_v1  ;;  %v85_v6 = vld [vmem:[#allocation5 + $0xd0] sm:$0xff]  ;;  %v84_v7 = vld [vmem:[#allocation5 + $0xc8] sm:$0xff]  ;;  %v83_v8 = vld [vmem:[#allocation5 + $0xc0] sm:$0xff]  ;;  %v94_v50 = vshrl.u32 %v93_v49, 7 }
  0x20   :  { %104 = vmatpush1.msra.mxu0 %v89_v2  ;;  %330 = vmatpush1.msra.mxu1 %v89_v2  ;;  %v82_v9 = vld [vmem:[#allocation5 + $0xb8] sm:$0xff]  ;;  %v81_v10 = vld [vmem:[#allocation5 + $0xb0] sm:$0xff]  ;;  %v80_v11 = vld [vmem:[#allocation5 + $0xa8] sm:$0xff] }
  0x21   :  { %105 = vmatprep.subr.mxu0 %v88_v3  ;;  %315 = vmatprep.subr.mxu1 %v88_v3  ;;  %v79_v12 = vld [vmem:[#allocation5 + $0xa0] sm:$0xff]  ;;  %v78_v13 = vld [vmem:[#allocation5 + $0x98] sm:$0xff]  ;;  %v77_v14 = vld [vmem:[#allocation5 + $0x90] sm:$0xff]  ;;  %v95_v51 = vsub.s32 0, %v94_v50  ;;  %v99_v53 = vsub.s32 1, %v94_v50 }
  0x22   :  { %106 = vmatpush1.msra.mxu0 %v87_v4  ;;  %331 = vmatpush1.msra.mxu1 %v87_v4  ;;  %v76_v15 = vld [vmem:[#allocation5 + $0x88] sm:$0xff]  ;;  %v75_v16 = vld [vmem:[#allocation5 + $0x80] sm:$0xff]  ;;  %v74_v17 = vld [vmem:[#allocation5 + $0x78] sm:$0xff] }
  0x23   :  { %107 = vmatprep.subr.mxu0 %v86_v5  ;;  %316 = vmatprep.subr.mxu1 %v86_v5  ;;  %v73_v18 = vld [vmem:[#allocation5 + $0x70] sm:$0xff]  ;;  %v72_v19 = vld [vmem:[#allocation5 + $0x68] sm:$0xff]  ;;  %v71_v20 = vld [vmem:[#allocation5 + $0x60] sm:$0xff] }
  0x24   :  { %108 = vmatpush1.msra.mxu0 %v85_v6  ;;  %332 = vmatpush1.msra.mxu1 %v85_v6  ;;  %v70_v21 = vld [vmem:[#allocation5 + $0x58] sm:$0xff]  ;;  %v69_v22 = vld [vmem:[#allocation5 + $0x50] sm:$0xff]  ;;  %v68_v23 = vld [vmem:[#allocation5 + $0x48] sm:$0xff] }
  0x25   :  { %109 = vmatprep.subr.mxu0 %v84_v7  ;;  %317 = vmatprep.subr.mxu1 %v84_v7  ;;  %v67_v24 = vld [vmem:[#allocation5 + $0x40] sm:$0xff]  ;;  %v66_v25 = vld [vmem:[#allocation5 + $0x38] sm:$0xff]  ;;  %v65_v26 = vld [vmem:[#allocation5 + $0x30] sm:$0xff] }
  0x26   :  { %110 = vmatpush1.msra.mxu0 %v83_v8  ;;  %333 = vmatpush1.msra.mxu1 %v83_v8  ;;  %v64_v27 = vld [vmem:[#allocation5 + $0x28] sm:$0xff]  ;;  %v63_v28 = vld [vmem:[#allocation5 + $0x20] sm:$0xff]  ;;  %v62_v29 = vld [vmem:[#allocation5 + $0x18] sm:$0xff] }
  0x27   :  { %111 = vmatprep.subr.mxu0 %v82_v9  ;;  %318 = vmatprep.subr.mxu1 %v82_v9  ;;  %v61_v30 = vld [vmem:[#allocation5 + $0x10] sm:$0xff]  ;;  %v60_v31 = vld [vmem:[#allocation5 + $0x8] sm:$0xff]  ;;  %v59_v32 = vld [vmem:[#allocation5] sm:$0xff] }
  0x28   :  { %112 = vmatpush1.msra.mxu0 %v81_v10  ;;  %334 = vmatpush1.msra.mxu1 %v81_v10  ;;  %v43_v33 = vld [vmem:[#allocation2] sm:$0xff]  ;;  %v44_v35 = vld [vmem:[#allocation2 + $0x8] sm:$0xff]  ;;  %v45_v37 = vld [vmem:[#allocation2 + $0x10] sm:$0xff] }
  0x29   :  { %113 = vmatprep.subr.mxu0 %v80_v11  ;;  %319 = vmatprep.subr.mxu1 %v80_v11  ;;  %v51_v34 = vld [vmem:[#allocation2 + $0x40] sm:$0xff]  ;;  %v52_v36 = vld [vmem:[#allocation2 + $0x48] sm:$0xff]  ;;  %v53_v38 = vld [vmem:[#allocation2 + $0x50] sm:$0xff] }
  0x2a   :  { %114 = vmatpush1.msra.mxu0 %v79_v12  ;;  %335 = vmatpush1.msra.mxu1 %v79_v12  ;;  %v46_v39 = vld [vmem:[#allocation2 + $0x18] sm:$0xff]  ;;  %v47_v41 = vld [vmem:[#allocation2 + $0x20] sm:$0xff]  ;;  %v48_v43 = vld [vmem:[#allocation2 + $0x28] sm:$0xff] }
  0x2b   :  { %115 = vmatprep.subr.mxu0 %v78_v13  ;;  %320 = vmatprep.subr.mxu1 %v78_v13  ;;  %v54_v40 = vld [vmem:[#allocation2 + $0x58] sm:$0xff]  ;;  %v55_v42 = vld [vmem:[#allocation2 + $0x60] sm:$0xff]  ;;  %v56_v44 = vld [vmem:[#allocation2 + $0x68] sm:$0xff] }
  0x2c   :  { %116 = vmatpush1.msra.mxu0 %v77_v14  ;;  %336 = vmatpush1.msra.mxu1 %v77_v14  ;;  %v49_v45 = vld [vmem:[#allocation2 + $0x30] sm:$0xff]  ;;  %v50_v47 = vld [vmem:[#allocation2 + $0x38] sm:$0xff]  ;;  %v91_v52 = vld [vmem:[%s520_s2] sm:$0x3]  ;;  %s427_s2 = smov [#allocation7]  }
  0x2d   :  { %117 = vmatprep.subr.mxu0 %v76_v15  ;;  %321 = vmatprep.subr.mxu1 %v76_v15  ;;  %v57_v46 = vld [vmem:[#allocation2 + $0x70] sm:$0xff]  ;;  %v58_v48 = vld [vmem:[#allocation2 + $0x78] sm:$0xff]  ;;  %v476_v54 = vrot.slane %v91_v52, %v95_v51  ;;  %v478_v55 = vrot.slane %v91_v52, %v99_v53  ;;  %s301_s26 = sshll.u32 %s427_s2, 4  ;;  %s302_s26 = int_to_ptr.vmem [resolvable:$true] %s301_s26 }
  0x2e   :  { %118 = vmatpush1.msra.mxu0 %v75_v16  ;;  %337 = vmatpush1.msra.mxu1 %v75_v16  ;;  %s394_s27 = scalar_lea.vmem %s302_s26, 4096  ;;  %p399_p11 = scmp.lt.s32.totalorder %s302_s26, %s302_s26 }
  0x2f   :  { %119 = vmatprep.subr.mxu0 %v74_v17  ;;  %322 = vmatprep.subr.mxu1 %v74_v17  ;;  %p395_p10 = scmp.ne.s32.totalorder %s302_s26, %s394_s27  ;;  %p400_p12 = scmp.lt.s32.totalorder %s394_s27, %s394_s27 }
  0x30   :  { %120 = vmatpush1.msra.mxu0 %v73_v18  ;;  %338 = vmatpush1.msra.mxu1 %v73_v18 }
  0x31   :  { %121 = vmatprep.subr.mxu0 %v72_v19  ;;  %323 = vmatprep.subr.mxu1 %v72_v19  ;;  %p401_p13 = por %p400_p12, %p399_p11 }
  0x32   :  { %122 = vmatpush1.msra.mxu0 %v71_v20  ;;  %339 = vmatpush1.msra.mxu1 %v71_v20 }
  0x33   :  { %123 = vmatprep.subr.mxu0 %v70_v21  ;;  %324 = vmatprep.subr.mxu1 %v70_v21  ;;  %p402_p0 = pnand %p401_p13, %p395_p10 }
  0x34   :  { %124 = vmatpush1.msra.mxu0 %v69_v22  ;;  %340 = vmatpush1.msra.mxu1 %v69_v22 }
  0x35   :  { %125 = vmatprep.subr.mxu0 %v68_v23  ;;  %325 = vmatprep.subr.mxu1 %v68_v23 }
  0x36   :  { %126 = vmatpush1.msra.mxu0 %v67_v24  ;;  %341 = vmatpush1.msra.mxu1 %v67_v24 }
  0x37   :  { %127 = vmatprep.subr.mxu0 %v66_v25  ;;  %326 = vmatprep.subr.mxu1 %v66_v25 }
  0x38   :  { %128 = vmatpush1.msra.mxu0 %v65_v26  ;;  %342 = vmatpush1.msra.mxu1 %v65_v26 }
  0x39   :  { %129 = vmatprep.subr.mxu0 %v64_v27  ;;  %327 = vmatprep.subr.mxu1 %v64_v27 }
  0x3a   :  { %130 = vmatpush1.msra.mxu0 %v63_v28  ;;  %343 = vmatpush1.msra.mxu1 %v63_v28 }
  0x3b   :  { %131 = vmatprep.subr.mxu0 %v62_v29  ;;  %328 = vmatprep.subr.mxu1 %v62_v29 }
  0x3c   :  { %132 = vmatpush1.msra.mxu0 %v61_v30  ;;  %344 = vmatpush1.msra.mxu1 %v61_v30 }
  0x3d   :  { %133 = vmatprep.subr.mxu0 %v60_v31  ;;  %329 = vmatprep.subr.mxu1 %v60_v31 }
  0x3e   :  { %134 = vmatpush1.msra.mxu0 %v59_v32  ;;  %345 = vmatpush1.msra.mxu1 %v59_v32 }
  0x3f   :  { %168 = vmatmul.mubr.f32.vlgmr.msra.gmra.mxu0 %v43_v33  ;;  %216 = vmatmul.mubr.f32.vlgmr.msra.gmra.mxu1 %v51_v34 }
  0x40   :  { %173 = vmatprep.mubr.f32.mxu0 %v426_v0  ;;  %221 = vmatprep.mubr.f32.mxu1 %v426_v0 }
  0x43   :  { %174 = vmatmul.mubr.f32.gmra.mxu0 %v44_v35  ;;  %222 = vmatmul.mubr.f32.gmra.mxu1 %v52_v36 }
  0x44   :  { %179 = vmatprep.mubr.f32.mxu0 %v426_v0  ;;  %227 = vmatprep.mubr.f32.mxu1 %v426_v0 }
  0x47   :  { %180 = vmatmul.mubr.f32.gmra.mxu0 %v45_v37  ;;  %228 = vmatmul.mubr.f32.gmra.mxu1 %v53_v38 }
  0x48   :  { %185 = vmatprep.mubr.f32.mxu0 %v426_v0  ;;  %233 = vmatprep.mubr.f32.mxu1 %v426_v0 }
  0x4b   :  { %186 = vmatmul.mubr.f32.gmra.mxu0 %v46_v39  ;;  %234 = vmatmul.mubr.f32.gmra.mxu1 %v54_v40 }
  0x4c   :  { %191 = vmatprep.mubr.f32.mxu0 %v426_v0  ;;  %239 = vmatprep.mubr.f32.mxu1 %v426_v0 }
  0x4f   :  { %192 = vmatmul.mubr.f32.gmra.mxu0 %v47_v41  ;;  %240 = vmatmul.mubr.f32.gmra.mxu1 %v55_v42 }
  0x50   :  { %197 = vmatprep.mubr.f32.mxu0 %v426_v0  ;;  %245 = vmatprep.mubr.f32.mxu1 %v426_v0 }
  0x53   :  { %198 = vmatmul.mubr.f32.gmra.mxu0 %v48_v43  ;;  %246 = vmatmul.mubr.f32.gmra.mxu1 %v56_v44 }
  0x54   :  { %203 = vmatprep.mubr.f32.mxu0 %v426_v0  ;;  %251 = vmatprep.mubr.f32.mxu1 %v426_v0 }
  0x57   :  { %204 = vmatmul.mubr.f32.gmra.mxu0 %v49_v45  ;;  %252 = vmatmul.mubr.f32.gmra.mxu1 %v57_v46 }
  0x58   :  { %209 = vmatprep.mubr.f32.mxu0 %v426_v0  ;;  %257 = vmatprep.mubr.f32.mxu1 %v426_v0 }
  0x5b   :  { %210 = vmatmul.mubr.f32.gmra.mxu0 %v50_v47  ;;  %258 = vmatmul.mubr.f32.gmra.mxu1 %v58_v48 }
  0xff   :  { %v169_v56 = vpop.f32.mrf.mxu0  ;;  %v217_v57 = vpop.f32.mrf.mxu1 }
 0x100   :  { %v170_v58 = vadd.f32 %v169_v56, %v476_v54  ;;  %v218_v59 = vadd.f32 %v217_v57, %v476_v54 }
 0x101   :  { %v171_v60 = vpop.f32.mrf.mxu0  ;;  %v219_v61 = vpop.f32.mrf.mxu1 }
 0x102   :  { %264 = vst [vmem:[#allocation7] sm:$0xff] %v170_v58  ;;  %280 = vst [vmem:[#allocation7 + $0x80] sm:$0xff] %v218_v59  ;;  %v172_v62 = vadd.f32 %v171_v60, %v478_v55  ;;  %v220_v63 = vadd.f32 %v219_v61, %v478_v55 }
 0x103   :  { %v175_v0 = vpop.f32.mrf.mxu0  ;;  %v223_v1 = vpop.f32.mrf.mxu1 }
 0x104   :  { %265 = vst [vmem:[#allocation7 + $0x8] sm:$0xff] %v172_v62  ;;  %281 = vst [vmem:[#allocation7 + $0x88] sm:$0xff] %v220_v63  ;;  %v176_v2 = vadd.f32 %v175_v0, %v476_v54  ;;  %v224_v3 = vadd.f32 %v223_v1, %v476_v54 }
 0x105   :  { %v177_v4 = vpop.f32.mrf.mxu0  ;;  %v225_v5 = vpop.f32.mrf.mxu1 }
 0x106   :  { %266 = vst [vmem:[#allocation7 + $0x10] sm:$0xff] %v176_v2  ;;  %282 = vst [vmem:[#allocation7 + $0x90] sm:$0xff] %v224_v3  ;;  %v178_v6 = vadd.f32 %v177_v4, %v478_v55  ;;  %v226_v7 = vadd.f32 %v225_v5, %v478_v55 }
 0x107   :  { %v181_v8 = vpop.f32.mrf.mxu0  ;;  %v229_v9 = vpop.f32.mrf.mxu1 }
 0x108   :  { %267 = vst [vmem:[#allocation7 + $0x18] sm:$0xff] %v178_v6  ;;  %283 = vst [vmem:[#allocation7 + $0x98] sm:$0xff] %v226_v7  ;;  %v182_v10 = vadd.f32 %v181_v8, %v476_v54  ;;  %v230_v11 = vadd.f32 %v229_v9, %v476_v54 }
 0x109   :  { %v183_v12 = vpop.f32.mrf.mxu0  ;;  %v231_v13 = vpop.f32.mrf.mxu1 }
 0x10a   :  { %268 = vst [vmem:[#allocation7 + $0x20] sm:$0xff] %v182_v10  ;;  %284 = vst [vmem:[#allocation7 + $0xa0] sm:$0xff] %v230_v11  ;;  %v184_v14 = vadd.f32 %v183_v12, %v478_v55  ;;  %v232_v15 = vadd.f32 %v231_v13, %v478_v55 }
 0x10b   :  { %v187_v16 = vpop.f32.mrf.mxu0  ;;  %v235_v17 = vpop.f32.mrf.mxu1 }
 0x10c   :  { %269 = vst [vmem:[#allocation7 + $0x28] sm:$0xff] %v184_v14  ;;  %285 = vst [vmem:[#allocation7 + $0xa8] sm:$0xff] %v232_v15  ;;  %v188_v18 = vadd.f32 %v187_v16, %v476_v54  ;;  %v236_v19 = vadd.f32 %v235_v17, %v476_v54 }
 0x10d   :  { %v189_v20 = vpop.f32.mrf.mxu0  ;;  %v237_v21 = vpop.f32.mrf.mxu1 }
 0x10e   :  { %270 = vst [vmem:[#allocation7 + $0x30] sm:$0xff] %v188_v18  ;;  %286 = vst [vmem:[#allocation7 + $0xb0] sm:$0xff] %v236_v19  ;;  %v190_v22 = vadd.f32 %v189_v20, %v478_v55  ;;  %v238_v23 = vadd.f32 %v237_v21, %v478_v55 }
 0x10f   :  { %v193_v24 = vpop.f32.mrf.mxu0  ;;  %v241_v25 = vpop.f32.mrf.mxu1 }
 0x110   :  { %271 = vst [vmem:[#allocation7 + $0x38] sm:$0xff] %v190_v22  ;;  %287 = vst [vmem:[#allocation7 + $0xb8] sm:$0xff] %v238_v23  ;;  %v194_v26 = vadd.f32 %v193_v24, %v476_v54  ;;  %v242_v27 = vadd.f32 %v241_v25, %v476_v54 }
 0x111   :  { %v195_v28 = vpop.f32.mrf.mxu0  ;;  %v243_v29 = vpop.f32.mrf.mxu1 }
 0x112   :  { %272 = vst [vmem:[#allocation7 + $0x40] sm:$0xff] %v194_v26  ;;  %288 = vst [vmem:[#allocation7 + $0xc0] sm:$0xff] %v242_v27  ;;  %v196_v30 = vadd.f32 %v195_v28, %v478_v55  ;;  %v244_v31 = vadd.f32 %v243_v29, %v478_v55 }
 0x113   :  { %v199_v32 = vpop.f32.mrf.mxu0  ;;  %v247_v33 = vpop.f32.mrf.mxu1 }
 0x114   :  { %273 = vst [vmem:[#allocation7 + $0x48] sm:$0xff] %v196_v30  ;;  %289 = vst [vmem:[#allocation7 + $0xc8] sm:$0xff] %v244_v31  ;;  %v200_v34 = vadd.f32 %v199_v32, %v476_v54  ;;  %v248_v35 = vadd.f32 %v247_v33, %v476_v54 }
 0x115   :  { %v201_v36 = vpop.f32.mrf.mxu0  ;;  %v249_v37 = vpop.f32.mrf.mxu1 }
 0x116   :  { %274 = vst [vmem:[#allocation7 + $0x50] sm:$0xff] %v200_v34  ;;  %290 = vst [vmem:[#allocation7 + $0xd0] sm:$0xff] %v248_v35  ;;  %v202_v38 = vadd.f32 %v201_v36, %v478_v55  ;;  %v250_v39 = vadd.f32 %v249_v37, %v478_v55 }
 0x117   :  { %v205_v40 = vpop.f32.mrf.mxu0  ;;  %v253_v41 = vpop.f32.mrf.mxu1 }
 0x118   :  { %275 = vst [vmem:[#allocation7 + $0x58] sm:$0xff] %v202_v38  ;;  %291 = vst [vmem:[#allocation7 + $0xd8] sm:$0xff] %v250_v39  ;;  %v206_v42 = vadd.f32 %v205_v40, %v476_v54  ;;  %v254_v43 = vadd.f32 %v253_v41, %v476_v54 }
 0x119   :  { %v207_v44 = vpop.f32.mrf.mxu0  ;;  %v255_v45 = vpop.f32.mrf.mxu1 }
 0x11a   :  { %276 = vst [vmem:[#allocation7 + $0x60] sm:$0xff] %v206_v42  ;;  %292 = vst [vmem:[#allocation7 + $0xe0] sm:$0xff] %v254_v43  ;;  %v208_v46 = vadd.f32 %v207_v44, %v478_v55  ;;  %v256_v47 = vadd.f32 %v255_v45, %v478_v55 }
 0x11b   :  { %v211_v48 = vpop.f32.mrf.mxu0  ;;  %v259_v49 = vpop.f32.mrf.mxu1 }
 0x11c   :  { %277 = vst [vmem:[#allocation7 + $0x68] sm:$0xff] %v208_v46  ;;  %293 = vst [vmem:[#allocation7 + $0xe8] sm:$0xff] %v256_v47  ;;  %v212_v50 = vadd.f32 %v211_v48, %v476_v54  ;;  %v260_v51 = vadd.f32 %v259_v49, %v476_v54 }
 0x11d   :  { %v213_v52 = vpop.f32.mrf.mxu0  ;;  %v261_v53 = vpop.f32.mrf.mxu1 }
 0x11e   :  { %278 = vst [vmem:[#allocation7 + $0x70] sm:$0xff] %v212_v50  ;;  %294 = vst [vmem:[#allocation7 + $0xf0] sm:$0xff] %v260_v51  ;;  %v214_v56 = vadd.f32 %v213_v52, %v478_v55  ;;  %v262_v57 = vadd.f32 %v261_v53, %v478_v55 }
 0x120   :  { %279 = vst [vmem:[#allocation7 + $0x78] sm:$0xff] %v214_v56  ;;  %295 = vst [vmem:[#allocation7 + $0xf8] sm:$0xff] %v262_v57 }
 0x121   :  { %405 = shalt.err (!%p402_p0)
}
 0x122   :  { %307 = dma.vmem_to_hbm [thread:$0]  %s302_s26, 4096, %s521_s3, [#allocation4], %s424_s22, %s424_s22, %s425_s23  }
 0x123   :  { %418 = dma.done.wait [#allocation4], 4096  }
 0x124   :  { %419 = vsyncadd [#allocation4], 4294963200 }
 0x125   :  { %311 = vsyncpa [#allocation3], 1 }
 0x126   :  { %312 = vsyncpa [#allocation6], 1 }
 0x127   :  { %313 = vsyncpa [#allocation4], 1 }

</bundles_post_ra>
